<compile_context>
chip_gen: v7x
topology: tpu7x:2x2x1
jax: 0.10.0
libtpu: 0.0.40
codegen_flags: <defaults>
</compile_context>

<pallas_src>
import functools

import jax
import jax.numpy as jnp
from jax import lax
from jax.experimental import pallas as pl
from jax.experimental.pallas import tpu as pltpu

LANES = 128
_F32_SUBLANES = 8
_BLOCK_BYTES_TARGET = 4 * 1024 * 1024   # per input per pipeline buffer (~4 MiB)
_VMEM_LIMIT_BYTES = 32 * 1024 * 1024    # 2 in x 2 buf x 4 MiB = 16 MiB fits w/ headroom
_NUM_SPLITS_MAX = 2                     # leading "parallel" axis; 2 TCs on v7x


def _sublane_multiple(dtype) -> int:
    """Minimum second-to-last tile multiple for a dtype (8/16/32 for 4/2/1-byte)."""
    itemsize = jnp.dtype(dtype).itemsize
    return (4 // itemsize) * _F32_SUBLANES


def _wmse_kernel(weight_ref, pred_ref, target_ref, out_ref, *,
                 rows, row_block, blocks_per_split, apply_row_mask):
    c = pl.program_id(0)   # split (core) index          -> "parallel"
    i = pl.program_id(1)   # row-block index in split    -> "arbitrary" reduction axis

    # Output block stays resident across the inner axis: init once.
    @pl.when(i == 0)
    def _():
        out_ref[...] = jnp.zeros_like(out_ref)

    w = weight_ref[0]
    t_raw = target_ref[...]
    # Compare in the target's native dtype (matches PyTorch), compute in f32.
    mask = jnp.where(t_raw > jnp.asarray(0.1, dtype=t_raw.dtype), w, jnp.float32(1.0))
    p = pred_ref[...].astype(jnp.float32)
    t = t_raw.astype(jnp.float32)
    d = (p - t) * mask            # fused: pred*mask - target*mask == (pred - target)*mask
    sq = d * d

    groups = row_block // _F32_SUBLANES
    sq3 = sq.reshape(groups, _F32_SUBLANES, LANES)

    if apply_row_mask:
        # Validity boundary falls on an 8-row sublane-group boundary (rows is a
        # multiple of the dtype sublane alignment), so mask whole groups:
        # one tiny (groups,1,1) iota + compare, one select per vreg.
        b = c * blocks_per_split + i                 # un-clamped global block id
        valid_rows = rows - b * row_block            # <= 0 for clamped overflow blocks
        g_start = lax.broadcasted_iota(jnp.int32, (groups, 1, 1), 0) * _F32_SUBLANES
        sq3 = jnp.where(g_start < valid_rows, sq3, jnp.float32(0.0))

    # Reduce over the leading (non-minor) axis: pure VPU vreg adds, no XLU.
    out_ref[...] += jnp.sum(sq3, axis=0)


def weighted_mse_loss(pred, target, weight=10.0, *, max_block_rows=None):
    """Pallas TPU implementation of WeightedMSELoss.forward."""
    assert pred.shape == target.shape, "pred/target shapes must match"
    n = pred.size

    pred_f = pred.reshape(-1)
    target_f = target.reshape(-1)

    sub = max(_sublane_multiple(pred.dtype), _sublane_multiple(target.dtype))
    chunk = sub * LANES
    itemsize = max(jnp.dtype(pred.dtype).itemsize, jnp.dtype(target.dtype).itemsize)

    # Kernel covers the aligned prefix; ragged tail (< chunk elems) handled below.
    main_n = (n // chunk) * chunk
    w32 = jnp.float32(weight)
    total = jnp.float32(0.0)

    if main_n > 0:
        rows = main_n // LANES
        pred_2d = (pred_f if main_n == n else pred_f[:main_n]).reshape(rows, LANES)
        target_2d = (target_f if main_n == n else target_f[:main_n]).reshape(rows, LANES)

        # Row block sized for ~4 MiB of the widest input dtype per buffer.
        cap = _BLOCK_BYTES_TARGET // (LANES * itemsize)
        if max_block_rows is not None:
            cap = min(cap, int(max_block_rows))
        cap = max((cap // sub) * sub, sub)
        row_block = min(cap, rows)                  # rows % sub == 0 -> row_block % sub == 0

        total_blocks = -(-rows // row_block)        # ceil div
        num_splits = _NUM_SPLITS_MAX if total_blocks >= _NUM_SPLITS_MAX else 1
        blocks_per_split = -(-total_blocks // num_splits)
        apply_row_mask = (rows % row_block != 0) or (num_splits * blocks_per_split != total_blocks)

        def in_map(c, i, _w):
            # Clamp so the DMA never reads past the array; the rare re-read of the
            # last block is fully masked to zero in-kernel.
            return (jnp.minimum(c * blocks_per_split + i, total_blocks - 1), 0)

        def out_map(c, i, _w):
            return (c, 0, 0)

        kernel = functools.partial(
            _wmse_kernel,
            rows=rows,
            row_block=row_block,
            blocks_per_split=blocks_per_split,
            apply_row_mask=apply_row_mask,
        )

        bytes_accessed = (main_n * (jnp.dtype(pred.dtype).itemsize
                                    + jnp.dtype(target.dtype).itemsize)
                          + num_splits * _F32_SUBLANES * LANES * 4 + 4)
        cost = pl.CostEstimate(flops=6 * main_n, transcendentals=0,
                               bytes_accessed=bytes_accessed)

        weight_arr = jnp.asarray([weight], dtype=jnp.float32)

        partials = pl.pallas_call(
            kernel,
            out_shape=jax.ShapeDtypeStruct((num_splits, _F32_SUBLANES, LANES), jnp.float32),
            grid_spec=pltpu.PrefetchScalarGridSpec(
                num_scalar_prefetch=1,
                grid=(num_splits, blocks_per_split),
                in_specs=[
                    pl.BlockSpec((row_block, LANES), in_map),
                    pl.BlockSpec((row_block, LANES), in_map),
                ],
                out_specs=pl.BlockSpec((None, _F32_SUBLANES, LANES), out_map),
            ),
            compiler_params=pltpu.CompilerParams(
                dimension_semantics=("parallel", "arbitrary"),
                vmem_limit_bytes=_VMEM_LIMIT_BYTES,
            ),
            cost_estimate=cost,
        )(weight_arr, pred_2d, target_2d)

        total = total + jnp.sum(partials)

    if main_n != n:
        # Tiny ragged tail (< chunk elements): a few jnp ops, one pass over the tail.
        p_tail = pred_f[main_n:].astype(jnp.float32)
        t_tail_raw = target_f[main_n:]
        mask_tail = jnp.where(t_tail_raw > jnp.asarray(0.1, dtype=t_tail_raw.dtype),
                              w32, jnp.float32(1.0))
        d_tail = (p_tail - t_tail_raw.astype(jnp.float32)) * mask_tail
        total = total + jnp.sum(d_tail * d_tail)

    # Single tiny cross-lane reduction + divide by the TRUE element count.
    return total / jnp.float32(n)


def _reference(pred, target, weight=10.0):
    mask = jnp.where(target > jnp.asarray(0.1, dtype=target.dtype),
                     jnp.float32(weight), jnp.float32(1.0))
    diff = pred.astype(jnp.float32) * mask - target.astype(jnp.float32) * mask
    return jnp.mean(diff * diff)


if __name__ == "__main__":
    key = jax.random.PRNGKey(0)
    k1, k2, k3, k4 = jax.random.split(key, 4)

    # Primary check: small NCHW regression batch [2, 4, 16, 16].
    pred = jax.random.normal(k1, (2, 4, 16, 16), dtype=jnp.float32)
    target = jax.random.uniform(k2, (2, 4, 16, 16), dtype=jnp.float32) * 0.3
    loss = weighted_mse_loss(pred, target, weight=10.0)
    jax.block_until_ready(loss)
    ref = _reference(pred, target, weight=10.0)
    assert jnp.allclose(loss, ref, rtol=1e-5, atol=1e-5), (loss, ref)

    # Secondary checks exercising the ragged-tail / ragged-block / uneven-split
    # paths at small sizes (max_block_rows shrinks the tile to force them).
    pred2 = jax.random.normal(k3, (3109,), dtype=jnp.float32)
    target2 = jax.random.uniform(k4, (3109,), dtype=jnp.float32) * 0.3
    ref2 = _reference(pred2, target2, weight=3.0)

    loss2 = weighted_mse_loss(pred2, target2, weight=3.0, max_block_rows=8)
    jax.block_until_ready(loss2)
    assert jnp.allclose(loss2, ref2, rtol=1e-5, atol=1e-5), (loss2, ref2)

    loss3 = weighted_mse_loss(pred2, target2, weight=3.0, max_block_rows=16)
    jax.block_until_ready(loss3)
    assert jnp.allclose(loss3, ref2, rtol=1e-5, atol=1e-5), (loss3, ref2)

    print("KERNEL_OK")
</pallas_src>

<mosaic_0001>
module attributes {stable_mosaic.version = 11 : i64} {
  func.func @_wmse_kernel(%arg0: i32, %arg1: i32, %arg2: memref<1xf32, #tpu.memory_space<smem>>, %arg3: memref<16x128xf32, #tpu.memory_space<vmem>>, %arg4: memref<16x128xf32, #tpu.memory_space<vmem>>, %arg5: memref<1x8x128xf32, #tpu.memory_space<vmem>>) attributes {dimension_semantics = [#tpu.dimension_semantics<parallel>, #tpu.dimension_semantics<arbitrary>], iteration_bounds = array<i64: 1, 1>, scalar_prefetch = 1 : i64, scratch_operands = 0 : i64, tpu.core_type = #tpu.core_type<tc>, window_params = [{transform_indices = @transform_0, window_bounds = array<i64: 16, 128>}, {transform_indices = @transform_1, window_bounds = array<i64: 16, 128>}, {transform_indices = @transform_2, window_bounds = array<i64: 1, 8, 128>}]} {
    %c0_i32 = arith.constant 0 : i32
    %0 = arith.cmpi eq, %arg1, %c0_i32 : i32
    %1 = arith.extui %0 : i1 to i32
    %c0_i32_0 = arith.constant 0 : i32
    %2 = arith.cmpi ne, %1, %c0_i32_0 : i32
    scf.if %2 {
      %cst_13 = arith.constant 0.000000e+00 : f32
      %22 = vector.broadcast %cst_13 : f32 to vector<8x128xf32>
      %c0_14 = arith.constant 0 : index
      %c0_15 = arith.constant 0 : index
      %c0_16 = arith.constant 0 : index
      %23 = vector.load %arg5[%c0_14, %c0_15, %c0_16] : memref<1x8x128xf32, #tpu.memory_space<vmem>>, vector<1x8x128xf32>
      %24 = vector.shape_cast %23 : vector<1x8x128xf32> to vector<8x128xf32>
      %25 = vector.shape_cast %22 : vector<8x128xf32> to vector<1x8x128xf32>
      tpu.vector_store %arg5[%c0_14, %c0_15, %c0_16], %25 {strides = array<i32>} : memref<1x8x128xf32, #tpu.memory_space<vmem>>, vector<1x8x128xf32>,
    } else {
    }
    %c0 = arith.constant 0 : index
    %3 = memref.load %arg2[%c0] : memref<1xf32, #tpu.memory_space<smem>>
    %c0_1 = arith.constant 0 : index
    %c0_2 = arith.constant 0 : index
    %4 = vector.load %arg4[%c0_1, %c0_2] : memref<16x128xf32, #tpu.memory_space<vmem>>, vector<16x128xf32>
    %cst = arith.constant 1.000000e-01 : f32
    %5 = vector.broadcast %cst : f32 to vector<16x128xf32>
    %6 = arith.cmpf ogt, %4, %5 : vector<16x128xf32>
    %cst_3 = arith.constant 1.000000e+00 : f32
    %7 = vector.broadcast %3 : f32 to vector<16x128xf32>
    %8 = vector.broadcast %cst_3 : f32 to vector<16x128xf32>
    %9 = arith.select %6, %7, %8 : vector<16x128xi1>, vector<16x128xf32>
    %c0_4 = arith.constant 0 : index
    %c0_5 = arith.constant 0 : index
    %10 = vector.load %arg3[%c0_4, %c0_5] : memref<16x128xf32, #tpu.memory_space<vmem>>, vector<16x128xf32>
    %11 = arith.subf %10, %4 : vector<16x128xf32>
    %12 = arith.mulf %11, %9 : vector<16x128xf32>
    %13 = arith.mulf %12, %12 : vector<16x128xf32>
    %14 = vector.shape_cast %13 : vector<16x128xf32> to vector<2x8x128xf32>
    %c0_6 = arith.constant 0 : index
    %c0_7 = arith.constant 0 : index
    %c0_8 = arith.constant 0 : index
    %15 = vector.load %arg5[%c0_6, %c0_7, %c0_8] : memref<1x8x128xf32, #tpu.memory_space<vmem>>, vector<1x8x128xf32>
    %16 = vector.shape_cast %15 : vector<1x8x128xf32> to vector<8x128xf32>
    %cst_9 = arith.constant dense<0.000000e+00> : vector<8x128xf32>
    %17 = vector.multi_reduction <add>, %14, %cst_9 [0] : vector<2x8x128xf32> to vector<8x128xf32>
    %18 = arith.addf %16, %17 : vector<8x128xf32>
    %c0_10 = arith.constant 0 : index
    %c0_11 = arith.constant 0 : index
    %c0_12 = arith.constant 0 : index
    %19 = vector.load %arg5[%c0_10, %c0_11, %c0_12] : memref<1x8x128xf32, #tpu.memory_space<vmem>>, vector<1x8x128xf32>
    %20 = vector.shape_cast %19 : vector<1x8x128xf32> to vector<8x128xf32>
    %21 = vector.shape_cast %18 : vector<8x128xf32> to vector<1x8x128xf32>
    tpu.vector_store %arg5[%c0_10, %c0_11, %c0_12], %21 {strides = array<i32>} : memref<1x8x128xf32, #tpu.memory_space<vmem>>, vector<1x8x128xf32>,
    return
  }
  func.func @transform_0(%arg0: i32, %arg1: i32, %arg2: memref<1xf32, #tpu.memory_space<smem>>) -> (i32, i32) {
    %c1_i32 = arith.constant 1 : i32
    %0 = arith.muli %arg0, %c1_i32 : i32
    %1 = arith.addi %0, %arg1 : i32
    %c0_i32 = arith.constant 0 : i32
    %2 = arith.minsi %1, %c0_i32 : i32
    %c0_i32_0 = arith.constant 0 : i32
    %c0_i32_1 = arith.constant 0 : i32
    return %2, %c0_i32_0 : i32, i32
  }
  func.func @transform_1(%arg0: i32, %arg1: i32, %arg2: memref<1xf32, #tpu.memory_space<smem>>) -> (i32, i32) {
    %c1_i32 = arith.constant 1 : i32
    %0 = arith.muli %arg0, %c1_i32 : i32
    %1 = arith.addi %0, %arg1 : i32
    %c0_i32 = arith.constant 0 : i32
    %2 = arith.minsi %1, %c0_i32 : i32
    %c0_i32_0 = arith.constant 0 : i32
    %c0_i32_1 = arith.constant 0 : i32
    return %2, %c0_i32_0 : i32, i32
  }
  func.func @transform_2(%arg0: i32, %arg1: i32, %arg2: memref<1xf32, #tpu.memory_space<smem>>) -> (i32, i32, i32) {
    %c0_i32 = arith.constant 0 : i32
    %c0_i32_0 = arith.constant 0 : i32
    %c0_i32_1 = arith.constant 0 : i32
    return %arg0, %c0_i32, %c0_i32_0 : i32, i32, i32
  }
}

</mosaic_0001>

<bundles_post_ra>
// kernel: tpu_custom_call.1
= control target key start
LH: loop header
LB: loop body
LE: loop exit
PB: predicated region body
PF: predicated region fallthrough
CT: control target
= control target key end

     0   :  { %9 = vsyncpa [#allocation5], 0  ;;  %s249_s0 = inlined_call_operand.<no memory space> [shape: f32[1], index: 0, kind: input, shape index: {}]   ;;  %s250_s1 = inlined_call_operand.hbm [shape: f32[16,128], index: 1, kind: input, shape index: {}]   ;;  %s251_s2 = inlined_call_operand.hbm [shape: f32[16,128], index: 2, kind: input, shape index: {}]   ;;  %s252_s3 = inlined_call_operand.hbm [shape: f32[1,8,128], index: 3, kind: output, shape index: {}]  }
   0x1   :  { %10 = vsyncpa [#allocation8], 0 }
   0x2   :  { %11 = vsyncpa [#allocation6], 0  ;;  %s185_s12 = smov [#allocation4]   ;;  %s113_s16 = scalar_lea.hbm %s250_s1, 256 }
   0x3   :  { %s23_s13 = sshll.u32 %s185_s12, 4  ;;  %p114_p0 = scmp.ne.s32.totalorder %s250_s1, %s113_s16  ;;  %s24_s13 = int_to_ptr.vmem [resolvable:$true] %s23_s13 }
   0x4   :  { %p117_p1 = scmp.lt.u32.totalorder %s113_s16, %s250_s1 }
   0x6   :  { %p119_p2 = pnand %p117_p1, %p114_p0 }
   0x8   :  { %122 = shalt.err (!%p119_p2)
}
   0x9   :  { %s123_s21 = scalar_lea.vmem %s24_s13, 256  ;;  %p128_p4 = scmp.lt.s32.totalorder %s24_s13, %s24_s13 }
   0xa   :  { %p124_p3 = scmp.ne.s32.totalorder %s24_s13, %s123_s21  ;;  %p129_p5 = scmp.lt.s32.totalorder %s123_s21, %s123_s21 }
   0xc   :  { %p130_p6 = por %p129_p5, %p128_p4 }
   0xe   :  { %p131_p7 = pnand %p130_p6, %p124_p3 }
  0x10   :  { %134 = shalt.err (!%p131_p7)
}
  0x11   :  { %s186_s22 = smov 128   ;;  %s187_s23 = smov 8  }
  0x12   :  { %29 = dma.hbm_to_vmem [thread:$0]  %s250_s1, 256, %s24_s13, [#allocation5], %s186_s22, %s186_s22, %s187_s23  }
  0x13   :  { %s188_s26 = smov [#allocation7]   ;;  %s135_s30 = scalar_lea.hbm %s251_s2, 256 }
  0x14   :  { %s41_s27 = sshll.u32 %s188_s26, 4  ;;  %p136_p8 = scmp.ne.s32.totalorder %s251_s2, %s135_s30  ;;  %s42_s27 = int_to_ptr.vmem [resolvable:$true] %s41_s27 }
  0x15   :  { %p139_p9 = scmp.lt.u32.totalorder %s135_s30, %s251_s2 }
  0x17   :  { %p141_p10 = pnand %p139_p9, %p136_p8 }
  0x19   :  { %144 = shalt.err (!%p141_p10)
}
  0x1a   :  { %s145_s8 = scalar_lea.vmem %s42_s27, 256  ;;  %p150_p12 = scmp.lt.s32.totalorder %s42_s27, %s42_s27 }
  0x1b   :  { %p146_p11 = scmp.ne.s32.totalorder %s42_s27, %s145_s8  ;;  %p151_p13 = scmp.lt.s32.totalorder %s145_s8, %s145_s8 }
  0x1d   :  { %p152_p0 = por %p151_p13, %p150_p12 }
  0x1f   :  { %p153_p1 = pnand %p152_p0, %p146_p11 }
  0x21   :  { %156 = shalt.err (!%p153_p1)
}
  0x22   :  { %47 = dma.hbm_to_vmem [thread:$0]  %s251_s2, 256, %s42_s27, [#allocation8], %s186_s22, %s186_s22, %s187_s23  }
  0x23   :  { %179 = dma.done.wait [#allocation5], 256  }
  0x24   :  { %180 = vsyncadd [#allocation5], 4294967040 }
  0x25   :  { %181 = dma.done.wait [#allocation8], 256  }
  0x26   :  { %182 = vsyncadd [#allocation8], 4294967040  ;;  %v72_v0 = vstv %s249_s0  ;;  %v68_v1 = vld [vmem:[#allocation7] sm:$0xff]  ;;  %v69_v2 = vld [vmem:[#allocation7 + $0x8] sm:$0xff]  ;;  %s189_s2 = smov [#allocation9]  }
  0x27   :  { %v75_v3 = vld [vmem:[#allocation4] sm:$0xff]  ;;  %vm70_vm0 = vcmp.gt.f32.partialorder %v68_v1, 0.1  ;;  %vm71_vm1 = vcmp.gt.f32.partialorder %v69_v2, 0.1  ;;  %v76_v4 = vld [vmem:[#allocation4 + $0x8] sm:$0xff] }
  0x28   :  { %v77_v5 = vsub.f32 %v75_v3, %v68_v1  ;;  %v73_v6 = vsel %vm70_vm0, %v72_v0, 1.0  ;;  %v74_v7 = vsel %vm71_vm1, %v72_v0, 1.0  ;;  %v78_v8 = vsub.f32 %v76_v4, %v69_v2  ;;  %s93_s12 = sshll.u32 %s189_s2, 4  ;;  %s94_s12 = int_to_ptr.vmem [resolvable:$true] %s93_s12 }
  0x29   :  { %s157_s0 = scalar_lea.vmem %s94_s12, 128  ;;  %p162_p3 = scmp.lt.s32.totalorder %s94_s12, %s94_s12 }
  0x2a   :  { %v79_v9 = vmul.f32 %v77_v5, %v73_v6  ;;  %v80_v10 = vmul.f32 %v78_v8, %v74_v7  ;;  %p158_p2 = scmp.ne.s32.totalorder %s94_s12, %s157_s0  ;;  %p163_p4 = scmp.lt.s32.totalorder %s157_s0, %s157_s0 }
  0x2c   :  { %v81_v11 = vmul.f32 %v79_v9, %v79_v9  ;;  %v82_v12 = vmul.f32 %v80_v10, %v80_v10  ;;  %p164_p5 = por %p163_p4, %p162_p3 }
  0x2e   :  { %v84_v13 = vadd.f32 %v82_v12, %v81_v11  ;;  %p165_p6 = pnand %p164_p5, %p158_p2 }
  0x30   :  { %86 = vst [vmem:[#allocation9] sm:$0xff] %v84_v13 }
  0x31   :  { %168 = shalt.err (!%p165_p6)
}
  0x32   :  { %s169_s15 = scalar_lea.hbm %s252_s3, 128 }
  0x33   :  { %p170_p7 = scmp.ne.s32.totalorder %s252_s3, %s169_s15  ;;  %p173_p8 = scmp.lt.u32.totalorder %s169_s15, %s252_s3 }
  0x35   :  { %p175_p9 = pnand %p173_p8, %p170_p7 }
  0x37   :  { %178 = shalt.err (!%p175_p9)
}
  0x38   :  { %96 = dma.vmem_to_hbm [thread:$0]  %s94_s12, 128, %s252_s3, [#allocation6]  }
  0x39   :  { %183 = dma.done.wait [#allocation6], 128  }
  0x3a   :  { %184 = vsyncadd [#allocation6], 4294967168 }
  0x3b   :  { %100 = vsyncpa [#allocation5], 1 }
  0x3c   :  { %101 = vsyncpa [#allocation8], 1 }
  0x3d   :  { %102 = vsyncpa [#allocation6], 1 }

</bundles_post_ra>
